<compile_context>
chip_gen: v7x
topology: tpu7x:2x2x1
jax: 0.10.0
libtpu: 0.0.40
codegen_flags: <defaults>
</compile_context>

<pallas_src>
import math

import jax
import jax.numpy as jnp
from jax import lax
from jax.experimental import pallas as pl
from jax.experimental.pallas import tpu as pltpu

_LOG_SQRT_2PI = 0.5 * math.log(2.0 * math.pi)
_BLK_CAP = 64          # batches per grid step; VMEM-safe on v5e/v6e/v7x
_VMEM_LIMIT = 32 * 1024 * 1024


# ----------------------------------------------------------------------------
# Host glue: single identity-filter conv per stage (patch extraction).
# Feature order of the extracted patches is (window_row, window_col, channel).
# ----------------------------------------------------------------------------
def _patches(x, win, stride):
    c = x.shape[-1]
    f = jnp.eye(win * win * c, dtype=x.dtype).reshape(win, win, c, win * win * c)
    return lax.conv_general_dilated(
        x, f, (stride, stride), "VALID",
        dimension_numbers=("NHWC", "HWIO", "NHWC"))


def _prep_weights(params):
    """Fold mu|sigma branches and the 4 max-pool offsets into single weights."""
    # Stage 1: 7x7 kernel scattered into an 8x8 window (conv stride1 + pool2).
    w1 = jnp.concatenate([params["w1_mu"][:, 0], params["w1_sigma"][:, 0]], 0)   # (16,7,7)
    rows = []
    for d1 in range(2):
        for d2 in range(2):
            wp = jnp.pad(w1, ((0, 0), (d1, 1 - d1), (d2, 1 - d2)))               # (16,8,8)
            rows.append(wp.reshape(16, 64))                                      # [out, patch]
    w1_all = jnp.concatenate(rows, axis=0).astype(jnp.float32)                   # (64,64)
    b1_col = jnp.concatenate([params["b1_mu"], params["b1_sigma"]]
                             ).reshape(16, 1).astype(jnp.float32)

    # Stage 2: block-diagonal over the merged 16 input channels, 5x5 kernel
    # scattered into a 6x6 window, 4 pool offsets along the output columns.
    z10x8 = jnp.zeros_like(params["w2_mu"])                                      # (10,8,5,5)
    w2 = jnp.concatenate([
        jnp.concatenate([params["w2_mu"], z10x8], axis=1),    # mu outputs <- cc 0..7
        jnp.concatenate([z10x8, params["w2_sigma"]], axis=1), # sg outputs <- cc 8..15
    ], axis=0)                                                                   # (20,16,5,5)
    cols = []
    for d1 in range(2):
        for d2 in range(2):
            wp = jnp.pad(w2, ((0, 0), (0, 0), (d1, 1 - d1), (d2, 1 - d2)))       # (20,16,6,6)
            cols.append(jnp.transpose(wp, (2, 3, 1, 0)).reshape(576, 20))
    w2_all = jnp.concatenate(cols, axis=1).astype(jnp.float32)                   # (576,80)
    b2_row = jnp.concatenate([params["b2_mu"], params["b2_sigma"]]
                             ).reshape(1, 20).astype(jnp.float32)
    return w1_all, b1_col, w2_all, b2_row


# ----------------------------------------------------------------------------
# Pallas kernels
# ----------------------------------------------------------------------------
def _stage1_kernel(p_ref, w_ref, b_ref, h_ref):
    """Conv2d(1->8,k=7) + MaxPool(2,2) + ReLU for both branches, one matmul.

    Transposed orientation: (64 out, 64 patch) @ (64 patch, BLK*128) so the
    (16, BLK*128) output store is lane-dense.
    """
    y = jnp.dot(w_ref[...], p_ref[...], preferred_element_type=jnp.float32)
    m = jnp.maximum(jnp.maximum(y[0:16], y[16:32]),
                    jnp.maximum(y[32:48], y[48:64]))          # max over pool offsets
    h_ref[...] = jnp.maximum(m + b_ref[...], 0.0)             # bias + ReLU


def _stage2_kernel(p_ref, w_ref, b_ref, eps_ref, z_ref, lp_ref):
    """Conv2d(8->10,k=5) + MaxPool(2,2) (+Softmax), rsample, log_prob."""
    y = jnp.dot(p_ref[...], w_ref[...], preferred_element_type=jnp.float32)
    y = jnp.maximum(jnp.maximum(y[:, 0:20], y[:, 20:40]),
                    jnp.maximum(y[:, 40:60], y[:, 60:80])) + b_ref[...]
    mu = y[:, 0:10]
    logits = y[:, 10:20]
    # nn.Softmax() legacy default dim -> dim=1 (channels) for 4D input.
    e = jnp.exp(logits - jnp.max(logits, axis=-1, keepdims=True))
    sigma = e / jnp.sum(e, axis=-1, keepdims=True)
    eps = eps_ref[...]
    z_ref[...] = mu + sigma * eps                              # rsample
    # log N(z; mu, sigma) with z - mu == sigma * eps (exact for the rsample path).
    lp = -0.5 * eps * eps - jnp.log(sigma) - _LOG_SQRT_2PI
    valid = (lax.broadcasted_iota(jnp.int32, lp.shape, 0) % 16) < 9   # mask pad rows
    lp = jnp.where(valid, lp, 0.0)
    lp_ref[...] = jnp.sum(lp, axis=-1, keepdims=True)          # per-row partial score


# ----------------------------------------------------------------------------
# Wrapper
# ----------------------------------------------------------------------------
def qz_forward(x, params, eps):
    """x: (B,1,28,28) NCHW.  Returns (z: (B,10,3,3) NCHW, score: (B,))."""
    x = x.reshape(-1, 1, 28, 28).astype(jnp.float32)
    B = x.shape[0]
    x_nhwc = jnp.transpose(x, (0, 2, 3, 1))                    # (B,28,28,1)

    w1_all, b1_col, w2_all, b2_row = _prep_weights(params)

    blk = B if B <= _BLK_CAP else _BLK_CAP
    bpad = -(-B // blk) * blk
    nsteps = bpad // blk
    cparams = pltpu.CompilerParams(dimension_semantics=("parallel",),
                                   vmem_limit_bytes=_VMEM_LIMIT)

    # ---- Stage 1: conv1(7x7) + maxpool(2) + ReLU, both branches ------------
    p1 = _patches(x_nhwc, 8, 2).reshape(B, 121, 64)            # 8x8 windows @ stride 2
    p1 = jnp.pad(p1, ((0, bpad - B), (0, 7), (0, 0)))          # (bpad,128,64)
    p1_t = jnp.transpose(p1.reshape(bpad * 128, 64))           # (64, bpad*128)

    h_t = pl.pallas_call(
        _stage1_kernel,
        out_shape=jax.ShapeDtypeStruct((16, bpad * 128), jnp.float32),
        grid=(nsteps,),
        in_specs=[
            pl.BlockSpec((64, blk * 128), lambda i: (0, i)),
            pl.BlockSpec((64, 64), lambda i: (0, 0)),
            pl.BlockSpec((16, 1), lambda i: (0, 0)),
        ],
        out_specs=pl.BlockSpec((16, blk * 128), lambda i: (0, i)),
        compiler_params=cparams,
    )(p1_t, w1_all, b1_col)

    # ---- Stage 2: conv2(5x5) + maxpool(2) (+softmax), rsample, log_prob ----
    h = jnp.transpose(h_t).reshape(bpad, 128, 16)[:, :121, :].reshape(bpad, 11, 11, 16)
    p2 = _patches(h, 6, 2).reshape(bpad, 9, 576)               # 6x6 windows @ stride 2
    p2 = jnp.pad(p2, ((0, 0), (0, 7), (0, 0))).reshape(bpad * 16, 576)

    eps_r = jnp.transpose(eps.astype(jnp.float32), (0, 2, 3, 1)).reshape(B, 9, 10)
    eps_r = jnp.pad(eps_r, ((0, bpad - B), (0, 7), (0, 0))).reshape(bpad * 16, 10)

    z_rows, lp_rows = pl.pallas_call(
        _stage2_kernel,
        out_shape=(jax.ShapeDtypeStruct((bpad * 16, 10), jnp.float32),
                   jax.ShapeDtypeStruct((bpad * 16, 1), jnp.float32)),
        grid=(nsteps,),
        in_specs=[
            pl.BlockSpec((blk * 16, 576), lambda i: (i, 0)),
            pl.BlockSpec((576, 80), lambda i: (0, 0)),
            pl.BlockSpec((1, 20), lambda i: (0, 0)),
            pl.BlockSpec((blk * 16, 10), lambda i: (i, 0)),
        ],
        out_specs=(pl.BlockSpec((blk * 16, 10), lambda i: (i, 0)),
                   pl.BlockSpec((blk * 16, 1), lambda i: (i, 0))),
        compiler_params=cparams,
    )(p2, w2_all, b2_row, eps_r)

    z = z_rows.reshape(bpad, 16, 10)[:B, :9, :].reshape(B, 3, 3, 10)
    z = jnp.transpose(z, (0, 3, 1, 2))                         # (B,10,3,3) NCHW
    score = jnp.sum(lp_rows.reshape(bpad, 16)[:B], axis=1)     # (B,)
    # TODO(synk): the original returns a `Result(z, score)` container that is
    # not defined in the provided source; we return a plain (z, score) tuple.
    return z, score


# ----------------------------------------------------------------------------
# Deterministic parameter init (PyTorch Conv2d default-style uniform bounds).
# ----------------------------------------------------------------------------
def init_params(key):
    def conv_init(k, out_c, in_c, ksize):
        fan_in = in_c * ksize * ksize
        bound = 1.0 / math.sqrt(fan_in)
        kw, kb = jax.random.split(k)
        w = jax.random.uniform(kw, (out_c, in_c, ksize, ksize), jnp.float32,
                               -bound, bound)
        b = jax.random.uniform(kb, (out_c,), jnp.float32, -bound, bound)
        return w, b

    keys = jax.random.split(key, 4)
    w1m, b1m = conv_init(keys[0], 8, 1, 7)
    w2m, b2m = conv_init(keys[1], 10, 8, 5)
    w1s, b1s = conv_init(keys[2], 8, 1, 7)
    w2s, b2s = conv_init(keys[3], 10, 8, 5)
    return dict(w1_mu=w1m, b1_mu=b1m, w2_mu=w2m, b2_mu=b2m,
                w1_sigma=w1s, b1_sigma=b1s, w2_sigma=w2s, b2_sigma=b2s)


if __name__ == "__main__":
    key = jax.random.PRNGKey(0)
    k_in, k_par, k_eps = jax.random.split(key, 3)

    B = 2
    x = jax.random.normal(k_in, (B, 1, 28, 28), jnp.float32)   # module forces 28x28
    params = init_params(k_par)
    # Standard-normal noise for Normal.rsample() (z = mu + sigma * eps).
    eps = jax.random.normal(k_eps, (B, 10, 3, 3), jnp.float32)

    z, score = jax.jit(qz_forward)(x, params, eps)
    jax.block_until_ready((z, score))

    assert z.shape == (B, 10, 3, 3) and z.dtype == jnp.float32
    assert score.shape == (B,) and score.dtype == jnp.float32
    assert bool(jnp.all(jnp.isfinite(z))) and bool(jnp.all(jnp.isfinite(score)))
    print("KERNEL_OK")
</pallas_src>

<mosaic_0001>
module attributes {stable_mosaic.version = 11 : i64} {
  func.func @_stage1_kernel(%arg0: i32, %arg1: memref<64x256xf32, #tpu.memory_space<vmem>>, %arg2: memref<64x64xf32, #tpu.memory_space<vmem>>, %arg3: memref<16x1xf32, #tpu.memory_space<vmem>>, %arg4: memref<16x256xf32, #tpu.memory_space<vmem>>) attributes {dimension_semantics = [#tpu.dimension_semantics<parallel>], iteration_bounds = array<i64: 1>, scalar_prefetch = 0 : i64, scratch_operands = 0 : i64, tpu.core_type = #tpu.core_type<tc>, window_params = [{transform_indices = @transform_0, window_bounds = array<i64: 64, 256>}, {pipeline_mode = #tpu.pipeline_mode<synchronous>, transform_indices = @transform_1, window_bounds = array<i64: 64, 64>}, {pipeline_mode = #tpu.pipeline_mode<synchronous>, transform_indices = @transform_2, window_bounds = array<i64: 16, 1>}, {transform_indices = @transform_3, window_bounds = array<i64: 16, 256>}]} {
    %c0 = arith.constant 0 : index
    %c0_0 = arith.constant 0 : index
    %0 = vector.load %arg2[%c0, %c0_0] : memref<64x64xf32, #tpu.memory_space<vmem>>, vector<64x64xf32>
    %c0_1 = arith.constant 0 : index
    %c0_2 = arith.constant 0 : index
    %1 = vector.load %arg1[%c0_1, %c0_2] : memref<64x256xf32, #tpu.memory_space<vmem>>, vector<64x256xf32>
    %cst = arith.constant dense<0.000000e+00> : vector<64x256xf32>
    %2 = tpu.matmul %0, %1, %cst {dimension_numbers = #tpu.dot_dimension_numbers<[1], [0], [0], [1], [0, 0, 1, 1], [], []>} : vector<64x64xf32>, vector<64x256xf32>, vector<64x256xf32> -> vector<64x256xf32>
    %3 = vector.extract_strided_slice %2 {offsets = [0, 0], sizes = [16, 256], strides = [1, 1]} : vector<64x256xf32> to vector<16x256xf32>
    %4 = vector.extract_strided_slice %2 {offsets = [16, 0], sizes = [16, 256], strides = [1, 1]} : vector<64x256xf32> to vector<16x256xf32>
    %5 = arith.maximumf %3, %4 : vector<16x256xf32>
    %6 = vector.extract_strided_slice %2 {offsets = [32, 0], sizes = [16, 256], strides = [1, 1]} : vector<64x256xf32> to vector<16x256xf32>
    %7 = vector.extract_strided_slice %2 {offsets = [48, 0], sizes = [16, 256], strides = [1, 1]} : vector<64x256xf32> to vector<16x256xf32>
    %8 = arith.maximumf %6, %7 : vector<16x256xf32>
    %9 = arith.maximumf %5, %8 : vector<16x256xf32>
    %c0_3 = arith.constant 0 : index
    %c0_4 = arith.constant 0 : index
    %10 = vector.load %arg3[%c0_3, %c0_4] : memref<16x1xf32, #tpu.memory_space<vmem>>, vector<16x1xf32>
    %11 = vector.broadcast %10 : vector<16x1xf32> to vector<16x256xf32>
    %12 = arith.addf %9, %11 : vector<16x256xf32>
    %cst_5 = arith.constant 0.000000e+00 : f32
    %13 = vector.broadcast %cst_5 : f32 to vector<16x256xf32>
    %14 = arith.maximumf %12, %13 : vector<16x256xf32>
    %c0_6 = arith.constant 0 : index
    %c0_7 = arith.constant 0 : index
    %15 = vector.load %arg4[%c0_6, %c0_7] : memref<16x256xf32, #tpu.memory_space<vmem>>, vector<16x256xf32>
    tpu.vector_store %arg4[%c0_6, %c0_7], %14 {strides = array<i32>} : memref<16x256xf32, #tpu.memory_space<vmem>>, vector<16x256xf32>,
    return
  }
  func.func @transform_0(%arg0: i32) -> (i32, i32) {
    %c0_i32 = arith.constant 0 : i32
    %c0_i32_0 = arith.constant 0 : i32
    return %c0_i32, %arg0 : i32, i32
  }
  func.func @transform_1(%arg0: i32) -> (i32, i32) {
    %c0_i32 = arith.constant 0 : i32
    %c0_i32_0 = arith.constant 0 : i32
    %c0_i32_1 = arith.constant 0 : i32
    return %c0_i32, %c0_i32_0 : i32, i32
  }
  func.func @transform_2(%arg0: i32) -> (i32, i32) {
    %c0_i32 = arith.constant 0 : i32
    %c0_i32_0 = arith.constant 0 : i32
    %c0_i32_1 = arith.constant 0 : i32
    return %c0_i32, %c0_i32_0 : i32, i32
  }
  func.func @transform_3(%arg0: i32) -> (i32, i32) {
    %c0_i32 = arith.constant 0 : i32
    %c0_i32_0 = arith.constant 0 : i32
    return %c0_i32, %arg0 : i32, i32
  }
}

module attributes {stable_mosaic.version = 11 : i64} {
  func.func @_stage2_kernel(%arg0: i32, %arg1: memref<32x576xf32, #tpu.memory_space<vmem>>, %arg2: memref<576x80xf32, #tpu.memory_space<vmem>>, %arg3: memref<1x20xf32, #tpu.memory_space<vmem>>, %arg4: memref<32x10xf32, #tpu.memory_space<vmem>>, %arg5: memref<32x10xf32, #tpu.memory_space<vmem>>, %arg6: memref<32x1xf32, #tpu.memory_space<vmem>>) attributes {dimension_semantics = [#tpu.dimension_semantics<parallel>], iteration_bounds = array<i64: 1>, scalar_prefetch = 0 : i64, scratch_operands = 0 : i64, tpu.core_type = #tpu.core_type<tc>, window_params = [{transform_indices = @transform_0, window_bounds = array<i64: 32, 576>}, {pipeline_mode = #tpu.pipeline_mode<synchronous>, transform_indices = @transform_1, window_bounds = array<i64: 576, 80>}, {pipeline_mode = #tpu.pipeline_mode<synchronous>, transform_indices = @transform_2, window_bounds = array<i64: 1, 20>}, {transform_indices = @transform_3, window_bounds = array<i64: 32, 10>}, {transform_indices = @transform_4, window_bounds = array<i64: 32, 10>}, {transform_indices = @transform_5, window_bounds = array<i64: 32, 1>}]} {
    %c0 = arith.constant 0 : index
    %c0_0 = arith.constant 0 : index
    %0 = vector.load %arg1[%c0, %c0_0] : memref<32x576xf32, #tpu.memory_space<vmem>>, vector<32x576xf32>
    %c0_1 = arith.constant 0 : index
    %c0_2 = arith.constant 0 : index
    %1 = vector.load %arg2[%c0_1, %c0_2] : memref<576x80xf32, #tpu.memory_space<vmem>>, vector<576x80xf32>
    %cst = arith.constant dense<0.000000e+00> : vector<32x80xf32>
    %2 = tpu.matmul %0, %1, %cst {dimension_numbers = #tpu.dot_dimension_numbers<[1], [0], [0], [1], [0, 0, 1, 1], [], []>} : vector<32x576xf32>, vector<576x80xf32>, vector<32x80xf32> -> vector<32x80xf32>
    %3 = vector.extract_strided_slice %2 {offsets = [0, 0], sizes = [32, 20], strides = [1, 1]} : vector<32x80xf32> to vector<32x20xf32>
    %4 = vector.extract_strided_slice %2 {offsets = [0, 20], sizes = [32, 20], strides = [1, 1]} : vector<32x80xf32> to vector<32x20xf32>
    %5 = arith.maximumf %3, %4 : vector<32x20xf32>
    %6 = vector.extract_strided_slice %2 {offsets = [0, 40], sizes = [32, 20], strides = [1, 1]} : vector<32x80xf32> to vector<32x20xf32>
    %7 = vector.extract_strided_slice %2 {offsets = [0, 60], sizes = [32, 20], strides = [1, 1]} : vector<32x80xf32> to vector<32x20xf32>
    %8 = arith.maximumf %6, %7 : vector<32x20xf32>
    %9 = arith.maximumf %5, %8 : vector<32x20xf32>
    %c0_3 = arith.constant 0 : index
    %c0_4 = arith.constant 0 : index
    %10 = vector.load %arg3[%c0_3, %c0_4] : memref<1x20xf32, #tpu.memory_space<vmem>>, vector<1x20xf32>
    %11 = vector.broadcast %10 : vector<1x20xf32> to vector<32x20xf32>
    %12 = arith.addf %9, %11 : vector<32x20xf32>
    %13 = vector.extract_strided_slice %12 {offsets = [0, 0], sizes = [32, 10], strides = [1, 1]} : vector<32x20xf32> to vector<32x10xf32>
    %14 = vector.extract_strided_slice %12 {offsets = [0, 10], sizes = [32, 10], strides = [1, 1]} : vector<32x20xf32> to vector<32x10xf32>
    %cst_5 = arith.constant dense<0xFF800000> : vector<32xf32>
    %15 = vector.multi_reduction <maximumf>, %14, %cst_5 [1] : vector<32x10xf32> to vector<32xf32>
    %16 = vector.shape_cast %15 : vector<32xf32> to vector<32x1xf32>
    %17 = vector.broadcast %16 : vector<32x1xf32> to vector<32x10xf32>
    %18 = arith.subf %14, %17 : vector<32x10xf32>
    %19 = math.exp %18 : vector<32x10xf32>
    %cst_6 = arith.constant dense<0.000000e+00> : vector<32xf32>
    %20 = vector.multi_reduction <add>, %19, %cst_6 [1] : vector<32x10xf32> to vector<32xf32>
    %21 = vector.shape_cast %20 : vector<32xf32> to vector<32x1xf32>
    %22 = vector.broadcast %21 : vector<32x1xf32> to vector<32x10xf32>
    %23 = arith.divf %19, %22 : vector<32x10xf32>
    %c0_7 = arith.constant 0 : index
    %c0_8 = arith.constant 0 : index
    %24 = vector.load %arg4[%c0_7, %c0_8] : memref<32x10xf32, #tpu.memory_space<vmem>>, vector<32x10xf32>
    %25 = arith.mulf %23, %24 : vector<32x10xf32>
    %26 = arith.addf %13, %25 : vector<32x10xf32>
    %c0_9 = arith.constant 0 : index
    %c0_10 = arith.constant 0 : index
    %27 = vector.load %arg5[%c0_9, %c0_10] : memref<32x10xf32, #tpu.memory_space<vmem>>, vector<32x10xf32>
    tpu.vector_store %arg5[%c0_9, %c0_10], %26 {strides = array<i32>} : memref<32x10xf32, #tpu.memory_space<vmem>>, vector<32x10xf32>,
    %cst_11 = arith.constant -5.000000e-01 : f32
    %28 = vector.broadcast %cst_11 : f32 to vector<32x10xf32>
    %29 = arith.mulf %28, %24 : vector<32x10xf32>
    %30 = arith.mulf %29, %24 : vector<32x10xf32>
    %31 = math.log %23 : vector<32x10xf32>
    %32 = arith.subf %30, %31 : vector<32x10xf32>
    %cst_12 = arith.constant 0.918938517 : f32
    %33 = vector.broadcast %cst_12 : f32 to vector<32x10xf32>
    %34 = arith.subf %32, %33 : vector<32x10xf32>
    %35 = tpu.iota {dimensions = array<i32: 0>} : vector<32x10xi32>
    %c16_i32 = arith.constant 16 : i32
    %c0_i32 = arith.constant 0 : i32
    %36 = arith.cmpi eq, %c16_i32, %c0_i32 : i32
    %c1_i32 = arith.constant 1 : i32
    %37 = arith.select %36, %c1_i32, %c16_i32 : i32
    %38 = vector.broadcast %37 : i32 to vector<32x10xi32>
    %39 = arith.remsi %35, %38 : vector<32x10xi32>
    %c0_i32_13 = arith.constant 0 : i32
    %40 = vector.broadcast %c0_i32_13 : i32 to vector<32x10xi32>
    %41 = arith.cmpi ne, %39, %40 : vector<32x10xi32>
    %c0_i32_14 = arith.constant 0 : i32
    %42 = vector.broadcast %c0_i32_14 : i32 to vector<32x10xi32>
    %43 = arith.cmpi slt, %39, %42 : vector<32x10xi32>
    %c0_i32_15 = arith.constant 0 : i32
    %44 = arith.cmpi slt, %37, %c0_i32_15 : i32
    %45 = vector.broadcast %44 : i1 to vector<32x10xi1>
    %46 = vector.broadcast %45 : vector<32x10xi1> to vector<32x10xi1>
    %47 = arith.xori %43, %46 : vector<32x10xi1>
    %48 = arith.andi %47, %41 : vector<32x10xi1>
    %49 = vector.broadcast %37 : i32 to vector<32x10xi32>
    %50 = arith.addi %39, %49 : vector<32x10xi32>
    %51 = arith.select %48, %50, %39 : vector<32x10xi1>, vector<32x10xi32>
    %c9_i32 = arith.constant 9 : i32
    %52 = vector.broadcast %c9_i32 : i32 to vector<32x10xi32>
    %53 = arith.cmpi slt, %51, %52 : vector<32x10xi32>
    %cst_16 = arith.constant 0.000000e+00 : f32
    %54 = vector.broadcast %cst_16 : f32 to vector<32x10xf32>
    %55 = arith.select %53, %34, %54 : vector<32x10xi1>, vector<32x10xf32>
    %cst_17 = arith.constant dense<0.000000e+00> : vector<32xf32>
    %56 = vector.multi_reduction <add>, %55, %cst_17 [1] : vector<32x10xf32> to vector<32xf32>
    %57 = vector.shape_cast %56 : vector<32xf32> to vector<32x1xf32>
    %c0_18 = arith.constant 0 : index
    %c0_19 = arith.constant 0 : index
    %58 = vector.load %arg6[%c0_18, %c0_19] : memref<32x1xf32, #tpu.memory_space<vmem>>, vector<32x1xf32>
    tpu.vector_store %arg6[%c0_18, %c0_19], %57 {strides = array<i32>} : memref<32x1xf32, #tpu.memory_space<vmem>>, vector<32x1xf32>,
    return
  }
  func.func @transform_0(%arg0: i32) -> (i32, i32) {
    %c0_i32 = arith.constant 0 : i32
    %c0_i32_0 = arith.constant 0 : i32
    return %arg0, %c0_i32 : i32, i32
  }
  func.func @transform_1(%arg0: i32) -> (i32, i32) {
    %c0_i32 = arith.constant 0 : i32
    %c0_i32_0 = arith.constant 0 : i32
    %c0_i32_1 = arith.constant 0 : i32
    return %c0_i32, %c0_i32_0 : i32, i32
  }
  func.func @transform_2(%arg0: i32) -> (i32, i32) {
    %c0_i32 = arith.constant 0 : i32
    %c0_i32_0 = arith.constant 0 : i32
    %c0_i32_1 = arith.constant 0 : i32
    return %c0_i32, %c0_i32_0 : i32, i32
  }
  func.func @transform_3(%arg0: i32) -> (i32, i32) {
    %c0_i32 = arith.constant 0 : i32
    %c0_i32_0 = arith.constant 0 : i32
    return %arg0, %c0_i32 : i32, i32
  }
  func.func @transform_4(%arg0: i32) -> (i32, i32) {
    %c0_i32 = arith.constant 0 : i32
    %c0_i32_0 = arith.constant 0 : i32
    return %arg0, %c0_i32 : i32, i32
  }
  func.func @transform_5(%arg0: i32) -> (i32, i32) {
    %c0_i32 = arith.constant 0 : i32
    %c0_i32_0 = arith.constant 0 : i32
    return %arg0, %c0_i32 : i32, i32
  }
}

</mosaic_0001>

<bundles_post_ra>
// kernel: qz_forward.2
= control target key start
LH: loop header
LB: loop body
LE: loop exit
PB: predicated region body
PF: predicated region fallthrough
CT: control target
= control target key end

     0   :  { %v251_v3 = vmov 0.0   ;;  %v252_v8 = vmov 0   ;;  %vm38_vm0 = vcmask 523264   ;;  %s379_s0 = inlined_call_operand.vmem [shape: f32[64,256], index: 0, kind: input, shape index: {}]   ;;  %s380_s2 = inlined_call_operand.vmem [shape: f32[16,1], index: 2, kind: input, shape index: {}]   ;;  %s381_s1 = inlined_call_operand.vmem [shape: f32[64,64], index: 1, kind: input, shape index: {}]   ;;  %s382_s3 = inlined_call_operand.vmem [shape: f32[16,256], index: 3, kind: output, shape index: {}]  }
   0x1   :  { %v23_v0 = vld [vmem:[%s379_s0 + $0x8] sm:$0xff]  ;;  %v25_v1 = vld [vmem:[%s379_s0 + $0x18] sm:$0xff]  ;;  %v22_v2 = vld [vmem:[%s379_s0] sm:$0xff]  ;;  %127 = vmatprep.mubr.f32.mxu0 %v251_v3  ;;  %151 = vmatprep.mubr.f32.mxu1 %v251_v3 }
   0x2   :  { %v224_v4 = vpack.c.bf16 %v25_v1, %v23_v0  ;;  %v24_v5 = vld [vmem:[%s379_s0 + $0x10] sm:$0xff]  ;;  %v27_v6 = vld [vmem:[%s379_s0 + $0x28] sm:$0xff]  ;;  %v29_v7 = vld [vmem:[%s379_s0 + $0x38] sm:$0xff]  ;;  %250 = vset.pattern.permute.xlu0 %v252_v8 }
   0x3   :  { %v226_v9 = vpack.c.bf16 %v24_v5, %v22_v2  ;;  %v228_v10 = vpack.c.bf16 %v29_v7, %v27_v6  ;;  %v26_v11 = vld [vmem:[%s379_s0 + $0x20] sm:$0xff]  ;;  %v28_v12 = vld [vmem:[%s379_s0 + $0x30] sm:$0xff]  ;;  %v31_v13 = vld [vmem:[%s379_s0 + $0x48] sm:$0xff] }
   0x4   :  { %225 = vmatprep.subr.bf16.mxu0 %v224_v4  ;;  %240 = vmatprep.subr.bf16.mxu1 %v224_v4  ;;  %v33_v14 = vld [vmem:[%s379_s0 + $0x58] sm:$0xff]  ;;  %v230_v15 = vpack.c.bf16 %v28_v12, %v26_v11  ;;  %v30_v17 = vld [vmem:[%s379_s0 + $0x40] sm:$0xff]  ;;  %v32_v18 = vld [vmem:[%s379_s0 + $0x50] sm:$0xff] }
   0x5   :  { %227 = vmatpush1.bf16.msra.mxu0 %v226_v9  ;;  %244 = vmatpush1.bf16.msra.mxu1 %v226_v9  ;;  %v232_v16 = vpack.c.bf16 %v33_v14, %v31_v13  ;;  %v35_v19 = vld [vmem:[%s379_s0 + $0x68] sm:$0xff]  ;;  %v37_v20 = vld [vmem:[%s379_s0 + $0x78] sm:$0xff]  ;;  %v234_v21 = vpack.c.bf16 %v32_v18, %v30_v17  ;;  %v188_v22 = vld [vmem:[%s380_s2] sm:$0xff] }
   0x6   :  { %229 = vmatprep.subr.bf16.mxu0 %v228_v10  ;;  %241 = vmatprep.subr.bf16.mxu1 %v228_v10  ;;  %v236_v23 = vpack.c.bf16 %v37_v20, %v35_v19  ;;  %v34_v24 = vld [vmem:[%s379_s0 + $0x60] sm:$0xff]  ;;  %v36_v25 = vld [vmem:[%s379_s0 + $0x70] sm:$0xff]  ;;  %v189_v26 = vld [vmem:[%s380_s2 + $0x8] sm:$0xff] }
   0x7   :  { %192 = vperm.xlu0 %250, %v188_v22   ;;  %v238_v27 = vpack.c.bf16 %v36_v25, %v34_v24  ;;  %v14_v28 = vld [vmem:[%s381_s1] sm:$0xff]  ;;  %v15_v30 = vld [vmem:[%s381_s1 + $0x8] sm:$0xff]  ;;  %v16_v32 = vld [vmem:[%s381_s1 + $0x10] sm:$0xff] }
   0x8   :  { %v18_v29 = vld [vmem:[%s381_s1 + $0x20] sm:$0xff]  ;;  %v19_v31 = vld [vmem:[%s381_s1 + $0x28] sm:$0xff]  ;;  %v20_v33 = vld [vmem:[%s381_s1 + $0x30] sm:$0xff] }
   0x9   :  { %231 = vmatpush1.bf16.msra.mxu0 %v230_v15  ;;  %245 = vmatpush1.bf16.msra.mxu1 %v230_v15  ;;  %v17_v34 = vld [vmem:[%s381_s1 + $0x18] sm:$0xff] }
   0xa   :  { %233 = vmatprep.subr.bf16.mxu0 %v232_v16  ;;  %242 = vmatprep.subr.bf16.mxu1 %v232_v16  ;;  %v21_v35 = vld [vmem:[%s381_s1 + $0x38] sm:$0xff] }
   0xb   :  { %197 = vperm.xlu0 %250, %v189_v26  }
   0xd   :  { %235 = vmatpush1.bf16.msra.mxu0 %v234_v21  ;;  %246 = vmatpush1.bf16.msra.mxu1 %v234_v21 }
   0xe   :  { %237 = vmatprep.subr.bf16.mxu0 %v236_v23  ;;  %243 = vmatprep.subr.bf16.mxu1 %v236_v23 }
  0x11   :  { %239 = vmatpush1.bf16.msra.mxu0 %v238_v27  ;;  %247 = vmatpush1.bf16.msra.mxu1 %v238_v27 }
  0x14   :  { %216 = vmatmul.mubr.msk.f32.vlgmr.msra.gmra.mrb[0].mxu0 %vm38_vm0, %v14_v28  ;;  %220 = vmatmul.mubr.msk.f32.vlgmr.msra.gmra.mrb[0].mxu1 %vm38_vm0, %v18_v29 }
  0x15   :  { %133 = vmatprep.mubr.f32.mxu0 %v251_v3  ;;  %157 = vmatprep.mubr.f32.mxu1 %v251_v3 }
  0x18   :  { %217 = vmatmul.mubr.msk.f32.gmra.mrb[2].mxu0 %vm38_vm0, %v15_v30  ;;  %221 = vmatmul.mubr.msk.f32.gmra.mrb[2].mxu1 %vm38_vm0, %v19_v31 }
  0x19   :  { %139 = vmatprep.mubr.f32.mxu0 %v251_v3  ;;  %163 = vmatprep.mubr.f32.mxu1 %v251_v3 }
  0x1c   :  { %218 = vmatmul.mubr.msk.f32.gmra.mrb[4].mxu0 %vm38_vm0, %v16_v32  ;;  %222 = vmatmul.mubr.msk.f32.gmra.mrb[4].mxu1 %vm38_vm0, %v20_v33 }
  0x1d   :  { %145 = vmatprep.mubr.f32.mxu0 %v251_v3  ;;  %169 = vmatprep.mubr.f32.mxu1 %v251_v3 }
  0x20   :  { %219 = vmatmul.mubr.msk.f32.gmra.mrb[6].mxu0 %vm38_vm0, %v17_v34  ;;  %223 = vmatmul.mubr.msk.f32.gmra.mrb[6].mxu1 %vm38_vm0, %v21_v35 }
  0x86   :  { %v193_v50 = vpop.permute.xlu0 %192 }
  0x8a   :  { %v198_v4 = vpop.permute.xlu0 %197 }
  0xe7   :  { %v129_v36 = vpop.f32.mrb[0].mxu0  ;;  %v153_v37 = vpop.f32.mrb[0].mxu1 }
  0xe8   :  { %v131_v38 = vpop.f32.mrb[1].mxu0  ;;  %v155_v39 = vpop.f32.mrb[1].mxu1 }
  0xeb   :  { %v135_v40 = vpop.f32.mrb[2].mxu0  ;;  %v159_v41 = vpop.f32.mrb[2].mxu1 }
  0xec   :  { %v137_v42 = vpop.f32.mrb[3].mxu0  ;;  %v161_v43 = vpop.f32.mrb[3].mxu1 }
  0xef   :  { %v141_v44 = vpop.f32.mrb[4].mxu0  ;;  %v165_v45 = vpop.f32.mrb[4].mxu1 }
  0xf0   :  { %v176_v46 = vmax.f32 %v129_v36, %v141_v44  ;;  %v180_v47 = vmax.f32 %v153_v37, %v165_v45  ;;  %v143_v48 = vpop.f32.mrb[5].mxu0  ;;  %v167_v49 = vpop.f32.mrb[5].mxu1 }
  0xf1   :  { %v177_v51 = vmax.f32 %v131_v38, %v143_v48  ;;  %v181_v52 = vmax.f32 %v155_v39, %v167_v49 }
  0xf2   :  { %v184_v53 = vmax.f32 %v176_v46, %v180_v47 }
  0xf3   :  { %v185_v54 = vmax.f32 %v177_v51, %v181_v52  ;;  %v147_v55 = vpop.f32.mrb[6].mxu0  ;;  %v171_v56 = vpop.f32.mrb[6].mxu1 }
  0xf4   :  { %v200_v57 = vadd.f32 %v193_v50, %v184_v53  ;;  %v178_v58 = vmax.f32 %v135_v40, %v147_v55  ;;  %v182_v59 = vmax.f32 %v159_v41, %v171_v56  ;;  %v149_v60 = vpop.f32.mrb[7].mxu0  ;;  %v173_v61 = vpop.f32.mrb[7].mxu1 }
  0xf5   :  { %v201_v62 = vadd.f32 %v193_v50, %v185_v54  ;;  %v179_v63 = vmax.f32 %v137_v42, %v149_v60  ;;  %v183_v0 = vmax.f32 %v161_v43, %v173_v61 }
  0xf6   :  { %v204_v1 = vmax.f32 %v200_v57, 0.0  ;;  %v186_v2 = vmax.f32 %v178_v58, %v182_v59 }
  0xf7   :  { %v205_v3 = vmax.f32 %v201_v62, 0.0  ;;  %v187_v5 = vmax.f32 %v179_v63, %v183_v0 }
  0xf8   :  { %208 = vst [vmem:[%s382_s3] sm:$0xff] %v204_v1  ;;  %v202_v6 = vadd.f32 %v198_v4, %v186_v2 }
  0xf9   :  { %209 = vst [vmem:[%s382_s3 + $0x8] sm:$0xff] %v205_v3  ;;  %v203_v7 = vadd.f32 %v198_v4, %v187_v5 }
  0xfa   :  { %v206_v8 = vmax.f32 %v202_v6, 0.0 }
  0xfb   :  { %v207_v9 = vmax.f32 %v203_v7, 0.0 }
  0xfc   :  { %210 = vst [vmem:[%s382_s3 + $0x10] sm:$0xff] %v206_v8 }
  0xfd   :  { %211 = vst [vmem:[%s382_s3 + $0x18] sm:$0xff] %v207_v9 }

// kernel: qz_forward.3
= control target key start
LH: loop header
LB: loop body
LE: loop exit
PB: predicated region body
PF: predicated region fallthrough
CT: control target
= control target key end

     0   :  { %vm111_vm0 = vcmask 523264   ;;  %s914_s26 = smov 88   ;;  %vm430_vm1 = vcmask 162896   ;;  %vm471_vm2 = vcmask 80896   ;;  %s916_s6 = smov 10   ;;  %vm653_vm5 = vcmask 7168   ;;  %s1322_s1 = inlined_call_operand.vmem [shape: f32[576,80], index: 1, kind: input, shape index: {}]   ;;  %s1323_s0 = inlined_call_operand.vmem [shape: f32[32,576], index: 0, kind: input, shape index: {}]   ;;  %s1324_s2 = inlined_call_operand.vmem [shape: f32[1,20], index: 2, kind: input, shape index: {}]   ;;  %s1325_s3 = inlined_call_operand.vmem [shape: f32[32,10], index: 3, kind: input, shape index: {}]   ;;  %s1326_s4 = inlined_call_operand.vmem [shape: f32[32,10], index: 4, kind: output, shape index: {0}]   ;;  %s1327_s5 = inlined_call_operand.vmem [shape: f32[32,1], index: 5, kind: output, shape index: {1}]  }
   0x1   :  { %v55_v0 = vld [vmem:[%s1322_s1 + $0x80] sm:$0xff]  ;;  %v56_v1 = vld [vmem:[%s1322_s1 + $0x88] sm:$0xff]  ;;  %v57_v11 = vld [vmem:[%s1322_s1 + $0x90] sm:$0xff] }
   0x2   :  { %v87_v2 = vld [vmem:[%s1322_s1 + $0x180] sm:$0xff]  ;;  %v797_v3 = vpack.c.bf16 %v56_v1, %v55_v0  ;;  %v88_v4 = vld [vmem:[%s1322_s1 + $0x188] sm:$0xff]  ;;  %v58_v13 = vld [vmem:[%s1322_s1 + $0x98] sm:$0xff] }
   0x3   :  { %v39_v5 = vld [vmem:[%s1322_s1] sm:$0xff]  ;;  %v40_v6 = vld [vmem:[%s1322_s1 + $0x8] sm:$0xff]  ;;  %v829_v7 = vpack.c.bf16 %v88_v4, %v87_v2  ;;  %v89_v14 = vld [vmem:[%s1322_s1 + $0x190] sm:$0xff]  ;;  %v801_v16 = vpack.c.bf16 %v58_v13, %v57_v11 }
   0x4   :  { %v799_v8 = vpack.c.bf16 %v40_v6, %v39_v5  ;;  %v71_v9 = vld [vmem:[%s1322_s1 + $0x100] sm:$0xff]  ;;  %v72_v10 = vld [vmem:[%s1322_s1 + $0x108] sm:$0xff]  ;;  %798 = vmatprep.subr.bf16.mxu0 %v797_v3  ;;  %v90_v15 = vld [vmem:[%s1322_s1 + $0x198] sm:$0xff] }
   0x5   :  { %v831_v12 = vpack.c.bf16 %v72_v10, %v71_v9  ;;  %830 = vmatprep.subr.bf16.mxu1 %v829_v7  ;;  %v833_v17 = vpack.c.bf16 %v90_v15, %v89_v14  ;;  %v41_v18 = vld [vmem:[%s1322_s1 + $0x10] sm:$0xff]  ;;  %v42_v19 = vld [vmem:[%s1322_s1 + $0x18] sm:$0xff]  ;;  %v59_v23 = vld [vmem:[%s1322_s1 + $0xa0] sm:$0xff] }
   0x6   :  { %800 = vmatpush3.bf16.msra.mxu0 %v799_v8  ;;  %v73_v20 = vld [vmem:[%s1322_s1 + $0x110] sm:$0xff]  ;;  %v803_v21 = vpack.c.bf16 %v42_v19, %v41_v18  ;;  %v74_v22 = vld [vmem:[%s1322_s1 + $0x118] sm:$0xff]  ;;  %v60_v24 = vld [vmem:[%s1322_s1 + $0xa8] sm:$0xff] }
   0x7   :  { %832 = vmatpush3.bf16.msra.mxu1 %v831_v12  ;;  %802 = vmatprep.subr.bf16.mxu0 %v801_v16  ;;  %v835_v25 = vpack.c.bf16 %v74_v22, %v73_v20  ;;  %v805_v26 = vpack.c.bf16 %v60_v24, %v59_v23  ;;  %v91_v27 = vld [vmem:[%s1322_s1 + $0x1a0] sm:$0xff]  ;;  %v92_v28 = vld [vmem:[%s1322_s1 + $0x1a8] sm:$0xff]  ;;  %v61_v35 = vld [vmem:[%s1322_s1 + $0xb0] sm:$0xff] }
   0x8   :  { %834 = vmatprep.subr.bf16.mxu1 %v833_v17  ;;  %v43_v29 = vld [vmem:[%s1322_s1 + $0x20] sm:$0xff]  ;;  %v837_v30 = vpack.c.bf16 %v92_v28, %v91_v27  ;;  %v44_v31 = vld [vmem:[%s1322_s1 + $0x28] sm:$0xff]  ;;  %v62_v36 = vld [vmem:[%s1322_s1 + $0xb8] sm:$0xff] }
   0x9   :  { %v75_v32 = vld [vmem:[%s1322_s1 + $0x120] sm:$0xff]  ;;  %v76_v33 = vld [vmem:[%s1322_s1 + $0x128] sm:$0xff]  ;;  %v807_v34 = vpack.c.bf16 %v44_v31, %v43_v29  ;;  %v93_v37 = vld [vmem:[%s1322_s1 + $0x1b0] sm:$0xff]  ;;  %v809_v39 = vpack.c.bf16 %v62_v36, %v61_v35 }
   0xa   :  { %804 = vmatpush3.bf16.msra.mxu0 %v803_v21  ;;  %v839_v38 = vpack.c.bf16 %v76_v33, %v75_v32  ;;  %v94_v40 = vld [vmem:[%s1322_s1 + $0x1b8] sm:$0xff]  ;;  %v45_v41 = vld [vmem:[%s1322_s1 + $0x30] sm:$0xff]  ;;  %v63_v46 = vld [vmem:[%s1322_s1 + $0xc0] sm:$0xff] }
   0xb   :  { %836 = vmatpush3.bf16.msra.mxu1 %v835_v25  ;;  %806 = vmatprep.subr.bf16.mxu0 %v805_v26  ;;  %v46_v42 = vld [vmem:[%s1322_s1 + $0x38] sm:$0xff]  ;;  %v841_v43 = vpack.c.bf16 %v94_v40, %v93_v37  ;;  %v77_v44 = vld [vmem:[%s1322_s1 + $0x130] sm:$0xff]  ;;  %v64_v47 = vld [vmem:[%s1322_s1 + $0xc8] sm:$0xff] }
   0xc   :  { %838 = vmatprep.subr.bf16.mxu1 %v837_v30  ;;  %v78_v45 = vld [vmem:[%s1322_s1 + $0x138] sm:$0xff]  ;;  %v95_v48 = vld [vmem:[%s1322_s1 + $0x1c0] sm:$0xff]  ;;  %v96_v49 = vld [vmem:[%s1322_s1 + $0x1c8] sm:$0xff]  ;;  %v811_v50 = vpack.c.bf16 %v46_v42, %v45_v41  ;;  %v813_v52 = vpack.c.bf16 %v64_v47, %v63_v46 }
   0xd   :  { %v843_v51 = vpack.c.bf16 %v78_v45, %v77_v44  ;;  %v47_v53 = vld [vmem:[%s1322_s1 + $0x40] sm:$0xff]  ;;  %v48_v54 = vld [vmem:[%s1322_s1 + $0x48] sm:$0xff]  ;;  %v845_v56 = vpack.c.bf16 %v96_v49, %v95_v48  ;;  %v65_v58 = vld [vmem:[%s1322_s1 + $0xd0] sm:$0xff] }
   0xe   :  { %808 = vmatpush3.bf16.msra.mxu0 %v807_v34  ;;  %v79_v55 = vld [vmem:[%s1322_s1 + $0x140] sm:$0xff]  ;;  %v80_v57 = vld [vmem:[%s1322_s1 + $0x148] sm:$0xff]  ;;  %v66_v59 = vld [vmem:[%s1322_s1 + $0xd8] sm:$0xff]  ;;  %v815_v62 = vpack.c.bf16 %v48_v54, %v47_v53 }
   0xf   :  { %840 = vmatpush3.bf16.msra.mxu1 %v839_v38  ;;  %810 = vmatprep.subr.bf16.mxu0 %v809_v39  ;;  %v97_v60 = vld [vmem:[%s1322_s1 + $0x1d0] sm:$0xff]  ;;  %v98_v61 = vld [vmem:[%s1322_s1 + $0x1d8] sm:$0xff]  ;;  %v847_v63 = vpack.c.bf16 %v80_v57, %v79_v55  ;;  %v817_v0 = vpack.c.bf16 %v66_v59, %v65_v58  ;;  %v67_v6 = vld [vmem:[%s1322_s1 + $0xe0] sm:$0xff] }
  0x10   :  { %842 = vmatprep.subr.bf16.mxu1 %v841_v43  ;;  %v49_v1 = vld [vmem:[%s1322_s1 + $0x50] sm:$0xff]  ;;  %v50_v2 = vld [vmem:[%s1322_s1 + $0x58] sm:$0xff]  ;;  %v849_v4 = vpack.c.bf16 %v98_v61, %v97_v60  ;;  %v68_v7 = vld [vmem:[%s1322_s1 + $0xe8] sm:$0xff] }
  0x11   :  { %v81_v3 = vld [vmem:[%s1322_s1 + $0x150] sm:$0xff]  ;;  %v82_v5 = vld [vmem:[%s1322_s1 + $0x158] sm:$0xff]  ;;  %v99_v8 = vld [vmem:[%s1322_s1 + $0x1e0] sm:$0xff]  ;;  %v819_v10 = vpack.c.bf16 %v50_v2, %v49_v1  ;;  %v821_v14 = vpack.c.bf16 %v68_v7, %v67_v6 }
  0x12   :  { %812 = vmatpush3.bf16.msra.mxu0 %v811_v50  ;;  %v100_v9 = vld [vmem:[%s1322_s1 + $0x1e8] sm:$0xff]  ;;  %v51_v11 = vld [vmem:[%s1322_s1 + $0x60] sm:$0xff]  ;;  %v851_v13 = vpack.c.bf16 %v82_v5, %v81_v3  ;;  %v22_v17 = vld [vmem:[%s1323_s0 + $0x18] sm:$0xff] }
  0x13   :  { %844 = vmatpush3.bf16.msra.mxu1 %v843_v51  ;;  %814 = vmatprep.subr.bf16.mxu0 %v813_v52  ;;  %v52_v12 = vld [vmem:[%s1322_s1 + $0x68] sm:$0xff]  ;;  %v83_v15 = vld [vmem:[%s1322_s1 + $0x160] sm:$0xff]  ;;  %v853_v18 = vpack.c.bf16 %v100_v9, %v99_v8  ;;  %v69_v20 = vld [vmem:[%s1322_s1 + $0xf0] sm:$0xff] }
  0x14   :  { %846 = vmatprep.subr.bf16.mxu1 %v845_v56  ;;  %v20_v16 = vld [vmem:[%s1323_s0 + $0x8] sm:$0xff]  ;;  %v70_v21 = vld [vmem:[%s1322_s1 + $0xf8] sm:$0xff]  ;;  %v101_v22 = vld [vmem:[%s1322_s1 + $0x1f0] sm:$0xff]  ;;  %273 = vmatprep.mubr.f32.mxu1 %v22_v17  ;;  %v823_v24 = vpack.c.bf16 %v52_v12, %v51_v11 }
  0x15   :  { %v84_v19 = vld [vmem:[%s1322_s1 + $0x168] sm:$0xff]  ;;  %188 = vmatprep.mubr.f32.mxu0 %v20_v16  ;;  %v102_v23 = vld [vmem:[%s1322_s1 + $0x1f8] sm:$0xff]  ;;  %v825_v26 = vpack.c.bf16 %v70_v21, %v69_v20  ;;  %v53_v27 = vld [vmem:[%s1322_s1 + $0x70] sm:$0xff] }
  0x16   :  { %816 = vmatpush3.bf16.msra.mxu0 %v815_v62  ;;  %v855_v25 = vpack.c.bf16 %v84_v19, %v83_v15  ;;  %v54_v28 = vld [vmem:[%s1322_s1 + $0x78] sm:$0xff]  ;;  %v85_v29 = vld [vmem:[%s1322_s1 + $0x170] sm:$0xff]  ;;  %v857_v30 = vpack.c.bf16 %v102_v23, %v101_v22  ;;  %v103_v32 = vld [vmem:[%s1322_s1 + $0x200] sm:$0xff] }
  0x17   :  { %848 = vmatpush3.bf16.msra.mxu1 %v847_v63  ;;  %818 = vmatprep.subr.bf16.mxu0 %v817_v0  ;;  %v86_v31 = vld [vmem:[%s1322_s1 + $0x178] sm:$0xff]  ;;  %v104_v33 = vld [vmem:[%s1322_s1 + $0x208] sm:$0xff]  ;;  %v827_v34 = vpack.c.bf16 %v54_v28, %v53_v27  ;;  %v105_v37 = vld [vmem:[%s1322_s1 + $0x210] sm:$0xff] }
  0x18   :  { %850 = vmatprep.subr.bf16.mxu1 %v849_v4  ;;  %v859_v35 = vpack.c.bf16 %v86_v31, %v85_v29  ;;  %v861_v36 = vpack.c.bf16 %v104_v33, %v103_v32  ;;  %v106_v38 = vld [vmem:[%s1322_s1 + $0x218] sm:$0xff]  ;;  %v19_v39 = vld [vmem:[%s1323_s0] sm:$0xff]  ;;  %v21_v40 = vld [vmem:[%s1323_s0 + $0x10] sm:$0xff] }
  0x19   :  { %v25_v41 = vld [vmem:[%s1323_s0 + $0x30] sm:$0xff]  ;;  %v865_v42 = vpack.c.bf16 %v106_v38, %v105_v37  ;;  %v27_v43 = vld [vmem:[%s1323_s0 + $0x40] sm:$0xff]  ;;  %v108_v45 = vld [vmem:[%s1322_s1 + $0x228] sm:$0xff] }
  0x1a   :  { %820 = vmatpush3.bf16.msra.mxu0 %v819_v10  ;;  %v107_v44 = vld [vmem:[%s1322_s1 + $0x220] sm:$0xff]  ;;  %v24_v46 = vld [vmem:[%s1323_s0 + $0x28] sm:$0xff]  ;;  %v26_v47 = vld [vmem:[%s1323_s0 + $0x38] sm:$0xff] }
  0x1b   :  { %852 = vmatpush3.bf16.msra.mxu1 %v851_v13  ;;  %822 = vmatprep.subr.bf16.mxu0 %v821_v14  ;;  %v30_v48 = vld [vmem:[%s1323_s0 + $0x58] sm:$0xff]  ;;  %v869_v49 = vpack.c.bf16 %v108_v45, %v107_v44  ;;  %v32_v50 = vld [vmem:[%s1323_s0 + $0x68] sm:$0xff]  ;;  %v109_v51 = vld [vmem:[%s1322_s1 + $0x230] sm:$0xff] }
  0x1c   :  { %854 = vmatprep.subr.bf16.mxu1 %v853_v18  ;;  %v110_v52 = vld [vmem:[%s1322_s1 + $0x238] sm:$0xff]  ;;  %v29_v53 = vld [vmem:[%s1323_s0 + $0x50] sm:$0xff]  ;;  %v31_v54 = vld [vmem:[%s1323_s0 + $0x60] sm:$0xff] }
  0x1d   :  { %v35_v55 = vld [vmem:[%s1323_s0 + $0x80] sm:$0xff]  ;;  %v873_v56 = vpack.c.bf16 %v110_v52, %v109_v51  ;;  %v37_v57 = vld [vmem:[%s1323_s0 + $0x90] sm:$0xff]  ;;  %v34_v58 = vld [vmem:[%s1323_s0 + $0x78] sm:$0xff] }
  0x1e   :  { %824 = vmatpush3.bf16.msra.mxu0 %v823_v24  ;;  %v36_v59 = vld [vmem:[%s1323_s0 + $0x88] sm:$0xff]  ;;  %v23_v60 = vld [vmem:[%s1323_s0 + $0x20] sm:$0xff]  ;;  %v33_v61 = vld [vmem:[%s1323_s0 + $0x70] sm:$0xff] }
  0x1f   :  { %856 = vmatpush3.bf16.msra.mxu1 %v855_v25  ;;  %826 = vmatprep.subr.bf16.mxu0 %v825_v26  ;;  %v28_v62 = vld [vmem:[%s1323_s0 + $0x48] sm:$0xff]  ;;  %v38_v63 = vld [vmem:[%s1323_s0 + $0x98] sm:$0xff]  ;;  %s913_s0 = smov 108   ;;  %v670_v44 = vld [vmem:[%s1324_s2] ss:$0 sm:$0xff]  ;;  %s915_s2 = smov 118  }
  0x20   :  { %858 = vmatprep.subr.bf16.mxu1 %v857_v30 }
  0x22   :  { %828 = vmatpush3.bf16.msra.mxu0 %v827_v34 }
  0x23   :  { %860 = vmatpush3.bf16.msra.mxu1 %v859_v35  ;;  %862 = vmatprep.subr.bf16.mxu0 %v861_v36 }
  0x24   :  { %877 = vmatprep.subr.bf16.mxu1 %v861_v36 }
  0x25   :  { %189 = vmatmul.mubr.f32.vlgmr.msra.gmra.mrb[0].mxu0 %v19_v39 }
  0x26   :  { %274 = vmatmul.mubr.f32.vlgmr.msra.gmra.mrb[0].mxu1 %v21_v40  ;;  %864 = vmatpush3.bf16.msra.mxu0 %v861_v36 }
  0x27   :  { %881 = vmatpush3.bf16.msra.mxu1 %v861_v36  ;;  %193 = vmatprep.mubr.f32.mxu0 %v25_v41 }
  0x28   :  { %278 = vmatprep.mubr.f32.mxu1 %v27_v43  ;;  %866 = vmatprep.subr.bf16.mxu0 %v865_v42 }
  0x29   :  { %194 = vmatmul.mubr.f32.gmra.mrb[2].mxu0 %v24_v46  ;;  %878 = vmatprep.subr.bf16.mxu1 %v865_v42 }
  0x2a   :  { %279 = vmatmul.mubr.f32.gmra.mrb[2].mxu1 %v26_v47  ;;  %868 = vmatpush3.bf16.msra.mxu0 %v865_v42 }
  0x2b   :  { %882 = vmatpush3.bf16.msra.mxu1 %v865_v42  ;;  %198 = vmatprep.mubr.f32.mxu0 %v30_v48 }
  0x2c   :  { %283 = vmatprep.mubr.f32.mxu1 %v32_v50  ;;  %870 = vmatprep.subr.bf16.mxu0 %v869_v49 }
  0x2d   :  { %199 = vmatmul.mubr.f32.gmra.mrb[4].mxu0 %v29_v53  ;;  %879 = vmatprep.subr.bf16.mxu1 %v869_v49 }
  0x2e   :  { %284 = vmatmul.mubr.f32.gmra.mrb[4].mxu1 %v31_v54  ;;  %872 = vmatpush3.bf16.msra.mxu0 %v869_v49 }
  0x2f   :  { %883 = vmatpush3.bf16.msra.mxu1 %v869_v49  ;;  %203 = vmatprep.mubr.f32.mxu0 %v35_v55 }
  0x30   :  { %288 = vmatprep.mubr.f32.mxu1 %v37_v57  ;;  %874 = vmatprep.subr.bf16.mxu0 %v873_v56 }
  0x31   :  { %204 = vmatmul.mubr.f32.gmra.mrb[6].mxu0 %v34_v58  ;;  %880 = vmatprep.subr.bf16.mxu1 %v873_v56 }
  0x32   :  { %289 = vmatmul.mubr.f32.gmra.mrb[6].mxu1 %v36_v59  ;;  %876 = vmatpush3.bf16.msra.mxu0 %v873_v56 }
  0x33   :  { %884 = vmatpush3.bf16.msra.mxu1 %v873_v56  ;;  %791 = vmatprep.mubr.msk.f32.mxu0 %vm111_vm0, %v23_v60 }
  0x34   :  { %794 = vmatprep.mubr.msk.f32.mxu1 %vm111_vm0, %v33_v61 }
  0x35   :  { %792 = vmatmul.mubr.msk.f32.vlgmr.msra.gmra.mrb[8].mxu0 %vm111_vm0, %v28_v62 }
  0x36   :  { %795 = vmatmul.mubr.msk.f32.vlgmr.msra.gmra.mrb[8].mxu1 %vm111_vm0, %v38_v63 }
  0xf8   :  { %v707_v0 = vpop.f32.mrb[0].mxu0 }
  0xf9   :  { %v751_v1 = vpop.f32.mrb[0].mxu1  ;;  %v708_v2 = vpop.f32.mrb[1].mxu0 }
  0xfa   :  { %v709_v3 = vadd.f32 %v708_v2, %v707_v0  ;;  %v752_v4 = vpop.f32.mrb[1].mxu1 }
  0xfb   :  { %v753_v5 = vadd.f32 %v752_v4, %v751_v1 }
  0xfc   :  { %v710_v6 = vpop.f32.mrb[2].mxu0 }
  0xfd   :  { %v754_v7 = vpop.f32.mrb[2].mxu1  ;;  %v711_v8 = vpop.f32.mrb[3].mxu0  ;;  %v276_v9 = vadd.f32 %v753_v5, %v709_v3 }
  0xfe   :  { %v712_v10 = vadd.f32 %v711_v8, %v710_v6  ;;  %v755_v11 = vpop.f32.mrb[3].mxu1 }
  0xff   :  { %v756_v12 = vadd.f32 %v755_v11, %v754_v7 }
 0x100   :  { %v713_v13 = vpop.f32.mrb[4].mxu0 }
 0x101   :  { %v757_v14 = vpop.f32.mrb[4].mxu1  ;;  %v714_v15 = vpop.f32.mrb[5].mxu0  ;;  %v281_v16 = vadd.f32 %v756_v12, %v712_v10 }
 0x102   :  { %v715_v17 = vadd.f32 %v714_v15, %v713_v13  ;;  %v758_v18 = vpop.f32.mrb[5].mxu1 }
 0x103   :  { %v759_v19 = vadd.f32 %v758_v18, %v757_v14 }
 0x104   :  { %v716_v20 = vpop.f32.mrb[6].mxu0 }
 0x105   :  { %v760_v21 = vpop.f32.mrb[6].mxu1  ;;  %v717_v22 = vpop.f32.mrb[7].mxu0  ;;  %v286_v23 = vadd.f32 %v759_v19, %v715_v17 }
 0x106   :  { %v718_v24 = vadd.f32 %v717_v22, %v716_v20  ;;  %v761_v25 = vpop.f32.mrb[7].mxu1 }
 0x107   :  { %v762_v26 = vadd.f32 %v761_v25, %v760_v21 }
 0x108   :  { %v793_v27 = vpop.f32.mrb[8].mxu0 }
 0x109   :  { %v366_v28 = vadd.f32 %v793_v27, %v281_v16  ;;  %v291_v29 = vadd.f32 %v762_v26, %v718_v24  ;;  %v796_v30 = vpop.f32.mrb[8].mxu1  ;;  %v360_v31 = vpop.f32.mrb[9].mxu0 }
 0x10a   :  { %v361_v32 = vadd.f32 %v360_v31, %v276_v9  ;;  %v370_v33 = vpop.f32.mrb[9].mxu1 }
 0x10b   :  { %v376_v34 = vadd.f32 %v796_v30, %v291_v29  ;;  %v371_v35 = vadd.f32 %v370_v33, %v286_v23  ;;  %385 = vrot.lane.b32.xlu0 %v366_v28, %s913_s0 }
 0x10c   :  { %383 = vrot.lane.b32.xlu1 %v361_v32, %s913_s0 }
 0x10f   :  { %389 = vrot.lane.b32.xlu0 %v376_v34, %s913_s0 }
 0x110   :  { %387 = vrot.lane.b32.xlu1 %v371_v35, %s913_s0 }
 0x17d   :  { %v386_v36 = vpop.permute.xlu0 %385 }
 0x17e   :  { %v396_v37 = vmax.f32 %v366_v28, %v386_v36  ;;  %v384_v38 = vpop.permute.xlu1 %383 }
 0x17f   :  { %v395_v40 = vmax.f32 %v361_v32, %v384_v38 }
 0x180   :  { %405 = vrot.lane.b32.xlu0 %v396_v37, %s914_s26 }
 0x181   :  { %v390_v39 = vpop.permute.xlu0 %389 }
 0x182   :  { %v398_v41 = vmax.f32 %v376_v34, %v390_v39  ;;  %v388_v42 = vpop.permute.xlu1 %387 }
 0x183   :  { %v397_v43 = vmax.f32 %v371_v35, %v388_v42  ;;  %v493_v42 = vld [vmem:[%s1325_s3 + $0x8] sm:$0xff] }
 0x184   :  { %409 = vrot.lane.b32.xlu1 %v398_v41, %s914_s26  ;;  %403 = vrot.lane.b32.xlu0 %v395_v40, %s914_s26 }
 0x188   :  { %407 = vrot.lane.b32.xlu1 %v397_v43, %s914_s26 }
 0x1f2   :  { %v406_v45 = vpop.permute.xlu0 %405 }
 0x1f3   :  { %v416_v46 = vmax.f32 %v396_v37, %v406_v45 }
 0x1f5   :  { %v1226_v47 = vadd.f32 %v670_v44, %v416_v46  ;;  %v580_v46 = vlaneseq }
 0x1f6   :  { %v404_v48 = vpop.permute.xlu0 %403  ;;  %v410_v49 = vpop.permute.xlu1 %409 }
 0x1f7   :  { %v415_v50 = vmax.f32 %v395_v40, %v404_v48  ;;  %v418_v51 = vmax.f32 %v398_v41, %v410_v49  ;;  %v434_v52 = vsel %vm430_vm1, %v1226_v47, -inf  ;;  %v492_v41 = vld [vmem:[%s1325_s3] sm:$0xff] }
 0x1f8   :  { %435 = vmax.xlane.f32.xlu0 %v434_v52  ;;  %v540_v45 = vmul.f32 -0.5, %v492_v41  ;;  %v581_v52 = vshrl.u32 %v580_v46, 7 }
 0x1f9   :  { %v1230_v53 = vadd.f32 %v670_v44, %v415_v50  ;;  %v1232_v54 = vadd.f32 %v670_v44, %v418_v51 }
 0x1fa   :  { %v408_v55 = vpop.permute.xlu1 %407  ;;  %v544_v51 = vmul.f32 %v540_v45, %v492_v41 }
 0x1fb   :  { %v417_v56 = vmax.f32 %v397_v43, %v408_v55  ;;  %v431_v57 = vsel %vm430_vm1, %v1230_v53, -inf  ;;  %v440_v58 = vsel %vm430_vm1, %v1232_v54, -inf  ;;  %v494_v43 = vld [vmem:[%s1325_s3 + $0x10] sm:$0xff] }
 0x1fc   :  { %432 = vmax.xlane.f32.xlu0 %v431_v57  ;;  %441 = vmax.xlane.f32.xlu1 %v440_v58  ;;  %v542_v50 = vmul.f32 -0.5, %v494_v43 }
 0x1fd   :  { %v1238_v59 = vadd.f32 %v670_v44, %v417_v56  ;;  %v495_v44 = vld [vmem:[%s1325_s3 + $0x18] sm:$0xff]  ;;  %v584_v56 = vadd.s32 24, %v581_v52 }
 0x1fe   :  { %v543_v48 = vmul.f32 -0.5, %v495_v44 }
 0x1ff   :  { %v437_v60 = vsel %vm430_vm1, %v1238_v59, -inf }
 0x200   :  { %438 = vmax.xlane.f32.xlu0 %v437_v60  ;;  %v547_v55 = vmul.f32 %v543_v48, %v495_v44 }
 0x285   :  { %v436_v61 = vpop.xlane.xlu0 %435 }
 0x286   :  { %v444_v62 = vsub.f32 %v1226_v47, %v436_v61  ;;  %v546_v61 = vmul.f32 %v542_v50, %v494_v43 }
 0x288   :  { %v449_v63 = vmul.f32 1.442695, %v444_v62 }
 0x289   :  { %v433_v0 = vpop.xlane.xlu0 %432  ;;  %v442_v1 = vpop.xlane.xlu1 %441 }
 0x28a   :  { %889 = vpow2.f32 %v449_v63  ;;  %v443_v2 = vsub.f32 %v1230_v53, %v433_v0  ;;  %v446_v3 = vsub.f32 %v1232_v54, %v442_v1  ;;  %v610_v0 = vand.u32 15, %v584_v56 }
 0x28c   :  { %v447_v4 = vmul.f32 1.442695, %v443_v2  ;;  %v453_v5 = vmul.f32 1.442695, %v446_v3  ;;  %vm636_vm3 = vcmp.lt.s32.totalorder %v610_v0, 9 }
 0x28d   :  { %v439_v6 = vpop.xlane.xlu0 %438 }
 0x28e   :  { %891 = vpow2.f32 %v447_v4  ;;  %v445_v7 = vsub.f32 %v1238_v59, %v439_v6 }
 0x28f   :  { %893 = vpow2.f32 %v453_v5 }
 0x290   :  { %v451_v8 = vmul.f32 1.442695, %v445_v7 }
 0x292   :  { %895 = vpow2.f32 %v451_v8 }
 0x294   :  { %v890_v9 = vpop.eup %889 }
 0x295   :  { %461 = vrot.lane.b32.xlu1 %v890_v9, %s915_s2 }
 0x298   :  { %v892_v10 = vpop.eup %891 }
 0x299   :  { %v894_v11 = vpop.eup %893  ;;  %459 = vrot.lane.b32.xlu1 %v892_v10, %s915_s2 }
 0x29a   :  { %465 = vrot.lane.b32.xlu0 %v894_v11, %s915_s2 }
 0x29c   :  { %v896_v12 = vpop.eup %895 }
 0x29d   :  { %463 = vrot.lane.b32.xlu1 %v896_v12, %s915_s2 }
 0x307   :  { %v462_v13 = vpop.permute.xlu1 %461 }
 0x308   :  { %v475_v14 = vsel %vm471_vm2, %v462_v13, 0.0  ;;  %v582_v13 = vadd.s32 8, %v581_v52 }
 0x309   :  { %476 = vadd.xlane.f32.xlu0 %v475_v14 }
 0x30b   :  { %v460_v15 = vpop.permute.xlu1 %459 }
 0x30c   :  { %v466_v16 = vpop.permute.xlu0 %465  ;;  %v472_v17 = vsel %vm471_vm2, %v460_v15, 0.0 }
 0x30d   :  { %v481_v18 = vsel %vm471_vm2, %v466_v16, 0.0  ;;  %473 = vadd.xlane.f32.xlu0 %v472_v17  ;;  %v596_v16 = vand.u32 15, %v582_v13 }
 0x30e   :  { %482 = vadd.xlane.f32.xlu1 %v481_v18 }
 0x30f   :  { %v464_v19 = vpop.permute.xlu1 %463  ;;  %vm634_vm4 = vcmp.lt.s32.totalorder %v596_v16, 9 }
 0x310   :  { %v478_v20 = vsel %vm471_vm2, %v464_v19, 0.0 }
 0x311   :  { %479 = vadd.xlane.f32.xlu0 %v478_v20 }
 0x396   :  { %v477_v21 = vpop.xlane.xlu0 %476 }
 0x397   :  { %897 = vrcp.f32 %v477_v21 }
 0x39a   :  { %v474_v22 = vpop.xlane.xlu0 %473 }
 0x39b   :  { %899 = vrcp.f32 %v474_v22  ;;  %v483_v23 = vpop.xlane.xlu1 %482 }
 0x39c   :  { %901 = vrcp.f32 %v483_v23 }
 0x39e   :  { %v480_v24 = vpop.xlane.xlu0 %479 }
 0x39f   :  { %903 = vrcp.f32 %v480_v24 }
 0x3a1   :  { %v898_v25 = vpop.eup %897 }
 0x3a2   :  { %v1254_v26 = vmul.f32 %v898_v25, %v890_v9 }
 0x3a4   :  { %905 = vlog2.f32 %v1254_v26 }
 0x3a5   :  { %v900_v27 = vpop.eup %899 }
 0x3a6   :  { %v902_v28 = vpop.eup %901  ;;  %v485_v29 = vmul.f32 %v900_v27, %v892_v10 }
 0x3a7   :  { %v1257_v30 = vmul.f32 %v902_v28, %v894_v11  ;;  %v541_v11 = vmul.f32 -0.5, %v493_v42 }
 0x3a8   :  { %907 = vlog2.f32 %v485_v29 }
 0x3a9   :  { %v904_v31 = vpop.eup %903  ;;  %909 = vlog2.f32 %v1257_v30 }
 0x3aa   :  { %v1260_v32 = vmul.f32 %v904_v31, %v896_v12  ;;  %v545_v12 = vmul.f32 %v541_v11, %v493_v42 }
 0x3ac   :  { %911 = vlog2.f32 %v1260_v32 }
 0x3ae   :  { %v906_v33 = vpop.eup %905 }
 0x3af   :  { %v551_v34 = vmul.f32 0.6931472, %v906_v33 }
 0x3b1   :  { %562 = vrot.lane.b32.xlu1 %v551_v34, %s915_s2 }
 0x3b2   :  { %v908_v35 = vpop.eup %907 }
 0x3b3   :  { %v910_v36 = vpop.eup %909  ;;  %v549_v37 = vmul.f32 0.6931472, %v908_v35 }
 0x3b4   :  { %v555_v38 = vmul.f32 0.6931472, %v910_v36 }
 0x3b5   :  { %560 = vrot.lane.b32.xlu1 %v549_v37, %s915_s2 }
 0x3b6   :  { %v912_v39 = vpop.eup %911  ;;  %566 = vrot.lane.b32.xlu0 %v555_v38, %s915_s2 }
 0x3b7   :  { %v553_v40 = vmul.f32 0.6931472, %v912_v39 }
 0x3b9   :  { %564 = vrot.lane.b32.xlu1 %v553_v40, %s915_s2 }
 0x3ba   :  { %500 = vrot.lane.b32.xlu0 %v492_v41, %s916_s6 }
 0x3bd   :  { %502 = vrot.lane.b32.xlu1 %v493_v42, %s916_s6 }
 0x3be   :  { %504 = vrot.lane.b32.xlu0 %v494_v43, %s916_s6 }
 0x3c1   :  { %506 = vrot.lane.b32.xlu1 %v495_v44, %s916_s6 }
 0x423   :  { %v563_v49 = vpop.permute.xlu1 %562 }
 0x424   :  { %v573_v15 = vsub.f32 %v545_v12, %v563_v49 }
 0x426   :  { %v672_v18 = vadd.f32 -0.9189385, %v573_v15 }
 0x427   :  { %v561_v57 = vpop.permute.xlu1 %560 }
 0x428   :  { %v567_v58 = vpop.permute.xlu0 %566  ;;  %v572_v60 = vsub.f32 %v544_v51, %v561_v57  ;;  %v638_v19 = vsel %vm634_vm4, %v672_v18, 0.0 }
 0x429   :  { %v575_v62 = vsub.f32 %v547_v55, %v567_v58  ;;  %v644_v20 = vsel %vm471_vm2, %v638_v19, 0.0 }
 0x42a   :  { %v671_v63 = vadd.f32 -0.9189385, %v572_v60 }
 0x42b   :  { %v565_v1 = vpop.permute.xlu1 %564  ;;  %v674_v5 = vadd.f32 -0.9189385, %v575_v62 }
 0x42c   :  { %v501_v2 = vpop.permute.xlu0 %500  ;;  %v574_v3 = vsub.f32 %v546_v61, %v565_v1  ;;  %v641_v4 = vsel %vm471_vm2, %v671_v63, 0.0 }
 0x42d   :  { %v512_v6 = vmul.f32 %v501_v2, %v485_v29  ;;  %642 = vadd.xlane.f32.xlu0 %v641_v4  ;;  %v640_v9 = vsel %vm636_vm3, %v674_v5, 0.0 }
 0x42e   :  { %v673_v7 = vadd.f32 -0.9189385, %v574_v3  ;;  %v650_v10 = vsel %vm471_vm2, %v640_v9, 0.0 }
 0x42f   :  { %520 = vrot.lane.b32.xlu1 %v512_v6, %s915_s2  ;;  %v503_v14 = vpop.permute.xlu1 %502 }
 0x430   :  { %v647_v8 = vsel %vm471_vm2, %v673_v7, 0.0  ;;  %v513_v17 = vmul.f32 %v503_v14, %v1254_v26  ;;  %v505_v21 = vpop.permute.xlu0 %504 }
 0x431   :  { %648 = vadd.xlane.f32.xlu0 %v647_v8  ;;  %v514_v22 = vmul.f32 %v505_v21, %v1260_v32 }
 0x433   :  { %v507_v23 = vpop.permute.xlu1 %506 }
 0x434   :  { %v515_v24 = vmul.f32 %v507_v23, %v1257_v30 }
 0x435   :  { %651 = vadd.xlane.f32.xlu0 %v650_v10 }
 0x44b   :  { %522 = vrot.lane.b32.xlu0 %v513_v17, %s915_s2 }
 0x453   :  { %645 = vadd.xlane.f32.xlu1 %v644_v20 }
 0x464   :  { %524 = vrot.lane.b32.xlu1 %v514_v22, %s915_s2 }
 0x468   :  { %526 = vrot.lane.b32.xlu1 %v515_v24, %s915_s2 }
 0x4a1   :  { %v521_v25 = vpop.permute.xlu1 %520 }
 0x4a2   :  { %v532_v26 = vadd.f32 %v521_v25, %v1230_v53 }
 0x4a4   :  { %536 = vst.msk [vmem:[%s1326_s4] sm:$0xff] %vm471_vm2, %v532_v26 }
 0x4ba   :  { %v643_v27 = vpop.xlane.xlu0 %642 }
 0x4bb   :  { %654 = vst.msk [vmem:[%s1327_s5] sm:$0xff] %vm653_vm5, %v643_v27 }
 0x4be   :  { %v649_v28 = vpop.xlane.xlu0 %648 }
 0x4bf   :  { %656 = vst.msk [vmem:[%s1327_s5 + $0x10] sm:$0xff] %vm653_vm5, %v649_v28 }
 0x4c2   :  { %v652_v29 = vpop.xlane.xlu0 %651 }
 0x4c3   :  { %657 = vst.msk [vmem:[%s1327_s5 + $0x18] sm:$0xff] %vm653_vm5, %v652_v29 }
 0x4c6   :  { %v523_v53 = vpop.permute.xlu0 %522 }
 0x4c7   :  { %v533_v30 = vadd.f32 %v523_v53, %v1226_v47 }
 0x4c9   :  { %537 = vst.msk [vmem:[%s1326_s4 + $0x8] sm:$0xff] %vm471_vm2, %v533_v30 }
 0x4e0   :  { %v646_v31 = vpop.xlane.xlu1 %645 }
 0x4e1   :  { %655 = vst.msk [vmem:[%s1327_s5 + $0x8] sm:$0xff] %vm653_vm5, %v646_v31 }
 0x4e4   :  { %v525_v32 = vpop.permute.xlu1 %524 }
 0x4e5   :  { %v534_v33 = vadd.f32 %v525_v32, %v1238_v59 }
 0x4e7   :  { %538 = vst.msk [vmem:[%s1326_s4 + $0x10] sm:$0xff] %vm471_vm2, %v534_v33 }
 0x4e8   :  { %v527_v34 = vpop.permute.xlu1 %526 }
 0x4e9   :  { %v535_v47 = vadd.f32 %v527_v34, %v1232_v54 }
 0x4eb   :  { %539 = vst.msk [vmem:[%s1326_s4 + $0x18] sm:$0xff] %vm471_vm2, %v535_v47 }

</bundles_post_ra>
